<compile_context>
chip_gen: v6e
topology: v6e:2x2x1
jax: 0.10.0
libtpu: 0.0.40
codegen_flags: <defaults>
</compile_context>

<pallas_src>
import numpy as np

import jax
import jax.numpy as jnp
from jax import lax
from jax.experimental import pallas as pl
from jax.experimental.pallas import tpu as pltpu


# ----------------------------------------------------------------------------
# Fused turbo-encoder kernel: one batch tile, all three streams.
# ----------------------------------------------------------------------------
def _turbo_encode_kernel(p_ref, u_ref, sys_ref, par1_ref, par2_ref):
    """p_ref   : (T,) int32 in SMEM — scalar-prefetched interleaver permutation
       u_ref   : (T, Bb) f32 bits in {0, 1}, time-major, batch tile on lanes
       sys_ref / par1_ref / par2_ref : (T, Bb) f32 outputs, values in {-1, +1}
    """
    T, Bb = u_ref.shape

    # Systematic stream: a single dense whole-slab store (2u - 1).
    sys_ref[...] = 2.0 * u_ref[...] - 1.0

    # sigma(b) = 1 - 2b maps GF(2): bit 0 -> +1, bit 1 -> -1, XOR -> multiply.
    # Registers start at bit 0 => sigma = +1.  (Hoisted out of the loop.)
    ones = jnp.ones((1, Bb), jnp.float32)

    def step(t, state):
        s0a, s1a, s0b, s1b = state                      # sigma-domain registers
        ua = 1.0 - 2.0 * u_ref[pl.ds(t, 1), :]          # straight stream row
        ub = 1.0 - 2.0 * u_ref[pl.ds(p_ref[t], 1), :]   # interleaved stream row
        aa = ua * s0a * s1a                             # a_t = u ^ s0 ^ s1
        ab = ub * s0b * s1b
        # Module output is 2*bit - 1 = -sigma(bit); parity bit = a_t ^ s1.
        par1_ref[pl.ds(t, 1), :] = -(aa * s1a)
        par2_ref[pl.ds(t, 1), :] = -(ab * s1b)
        return (aa, s0a, ab, s0b)                       # (s0, s1) <- (a_t, s0)

    lax.fori_loop(0, T, step, (ones, ones, ones, ones), unroll=min(T, 8))


def _choose_block_b(batch):
    # Tile the lane (batch) axis only when it divides cleanly into 128-lane
    # chunks; otherwise take the whole batch as one lane-dense tile.
    if batch >= 256 and batch % 128 == 0:
        return 128
    return batch


def turbo_code_forward(inputs, p_array):
    """ENC_TurboCode.forward: inputs (B, T, 1) bits -> codes (B, T, 3) in {-1,+1}."""
    batch, block_len, _ = inputs.shape
    u_tm = jnp.transpose(inputs[..., 0], (1, 0)).astype(jnp.float32)   # (T, B)
    p_array = p_array.astype(jnp.int32)

    block_b = _choose_block_b(batch)
    grid = (batch // block_b,)
    tile_spec = pl.BlockSpec((block_len, block_b), lambda j, p: (0, j))

    sys_tm, par1_tm, par2_tm = pl.pallas_call(
        _turbo_encode_kernel,
        out_shape=[jax.ShapeDtypeStruct((block_len, batch), jnp.float32)] * 3,
        grid_spec=pltpu.PrefetchScalarGridSpec(
            num_scalar_prefetch=1,
            grid=grid,
            in_specs=[tile_spec],
            out_specs=[tile_spec] * 3,
        ),
        compiler_params=pltpu.CompilerParams(
            dimension_semantics=("parallel",)),
        cost_estimate=pl.CostEstimate(
            flops=30 * block_len * batch,
            transcendentals=0,
            bytes_accessed=4 * (4 * block_len * batch + block_len)),
    )(p_array, u_tm)

    codes_tm = jnp.stack([sys_tm, par1_tm, par2_tm], axis=-1)   # (T, B, 3)
    return jnp.transpose(codes_tm, (1, 0, 2))                   # (B, T, 3)


# ----------------------------------------------------------------------------
# Pure-NumPy reference (matches turbo_enc semantics with the (7,5) RSC pair).
# ----------------------------------------------------------------------------
def _reference_turbo_codes(inputs_np, p_np):
    u = inputs_np[..., 0].astype(np.int64)          # (B, T) bits
    nb, tl = u.shape

    def rsc_parity(bits):
        s0 = s1 = 0
        out = np.zeros_like(bits)
        for t in range(tl):
            a = bits[t] ^ s0 ^ s1
            out[t] = a ^ s1
            s0, s1 = a, s0
        return out

    codes = np.zeros((nb, tl, 3), np.float32)
    for b in range(nb):
        codes[b, :, 0] = u[b]
        codes[b, :, 1] = rsc_parity(u[b])
        codes[b, :, 2] = rsc_parity(u[b][p_np])     # interleaved: v[t] = u[p[t]]
    return 2.0 * codes - 1.0


if __name__ == "__main__":
    B, T = 2, 8   # num_block (batch), block_len

    key = jax.random.PRNGKey(0)
    k_in, k_perm = jax.random.split(key)
    inputs = jax.random.bernoulli(k_in, 0.5, (B, T, 1)).astype(jnp.float32)
    p_array = jax.random.permutation(k_perm, T).astype(jnp.int32)

    fwd = jax.jit(turbo_code_forward)
    codes = jax.block_until_ready(fwd(inputs, p_array))

    assert codes.shape == (B, T, 3) and codes.dtype == jnp.float32
    assert bool(jnp.all(jnp.isfinite(codes)))

    ref = _reference_turbo_codes(np.asarray(inputs), np.asarray(p_array))
    assert np.allclose(np.asarray(codes), ref), "mismatch vs reference turbo encoder"
    print("KERNEL_OK")
</pallas_src>

<mosaic_0001>
module attributes {stable_mosaic.version = 11 : i64} {
  func.func @_turbo_encode_kernel(%arg0: i32, %arg1: memref<8xi32, #tpu.memory_space<smem>>, %arg2: memref<8x2xf32, #tpu.memory_space<vmem>>, %arg3: memref<8x2xf32, #tpu.memory_space<vmem>>, %arg4: memref<8x2xf32, #tpu.memory_space<vmem>>, %arg5: memref<8x2xf32, #tpu.memory_space<vmem>>) attributes {dimension_semantics = [#tpu.dimension_semantics<parallel>], iteration_bounds = array<i64: 1>, scalar_prefetch = 1 : i64, scratch_operands = 0 : i64, tpu.core_type = #tpu.core_type<tc>, window_params = [{transform_indices = @transform_0, window_bounds = array<i64: 8, 2>}, {transform_indices = @transform_1, window_bounds = array<i64: 8, 2>}, {transform_indices = @transform_2, window_bounds = array<i64: 8, 2>}, {transform_indices = @transform_3, window_bounds = array<i64: 8, 2>}]} {
    %c0 = arith.constant 0 : index
    %c0_0 = arith.constant 0 : index
    %0 = vector.load %arg2[%c0, %c0_0] : memref<8x2xf32, #tpu.memory_space<vmem>>, vector<8x2xf32>
    %cst = arith.constant 2.000000e+00 : f32
    %1 = vector.broadcast %cst : f32 to vector<8x2xf32>
    %2 = arith.mulf %1, %0 : vector<8x2xf32>
    %cst_1 = arith.constant 1.000000e+00 : f32
    %3 = vector.broadcast %cst_1 : f32 to vector<8x2xf32>
    %4 = arith.subf %2, %3 : vector<8x2xf32>
    %c0_2 = arith.constant 0 : index
    %c0_3 = arith.constant 0 : index
    %5 = vector.load %arg3[%c0_2, %c0_3] : memref<8x2xf32, #tpu.memory_space<vmem>>, vector<8x2xf32>
    tpu.vector_store %arg3[%c0_2, %c0_3], %4 {strides = array<i32>} : memref<8x2xf32, #tpu.memory_space<vmem>>, vector<8x2xf32>,
    %cst_4 = arith.constant 1.000000e+00 : f32
    %6 = vector.broadcast %cst_4 : f32 to vector<1x2xf32>
    %c0_i32 = arith.constant 0 : i32
    %7 = arith.index_cast %c0_i32 : i32 to index
    %c0_5 = arith.constant 0 : index
    %8 = vector.load %arg2[%7, %c0_5] : memref<8x2xf32, #tpu.memory_space<vmem>>, vector<1x2xf32>
    %cst_6 = arith.constant 2.000000e+00 : f32
    %9 = vector.broadcast %cst_6 : f32 to vector<1x2xf32>
    %10 = arith.mulf %9, %8 : vector<1x2xf32>
    %cst_7 = arith.constant 1.000000e+00 : f32
    %11 = vector.broadcast %cst_7 : f32 to vector<1x2xf32>
    %12 = arith.subf %11, %10 : vector<1x2xf32>
    %13 = arith.index_cast %c0_i32 : i32 to index
    %14 = memref.load %arg1[%13] : memref<8xi32, #tpu.memory_space<smem>>
    %15 = arith.index_cast %14 : i32 to index
    %c0_8 = arith.constant 0 : index
    %16 = vector.load %arg2[%15, %c0_8] : memref<8x2xf32, #tpu.memory_space<vmem>>, vector<1x2xf32>
    %cst_9 = arith.constant 2.000000e+00 : f32
    %17 = vector.broadcast %cst_9 : f32 to vector<1x2xf32>
    %18 = arith.mulf %17, %16 : vector<1x2xf32>
    %cst_10 = arith.constant 1.000000e+00 : f32
    %19 = vector.broadcast %cst_10 : f32 to vector<1x2xf32>
    %20 = arith.subf %19, %18 : vector<1x2xf32>
    %21 = arith.mulf %12, %6 : vector<1x2xf32>
    %22 = arith.mulf %21, %6 : vector<1x2xf32>
    %23 = arith.mulf %20, %6 : vector<1x2xf32>
    %24 = arith.mulf %23, %6 : vector<1x2xf32>
    %25 = arith.mulf %22, %6 : vector<1x2xf32>
    %cst_11 = arith.constant 0.000000e+00 : f32
    %26 = vector.broadcast %cst_11 : f32 to vector<1x2xf32>
    %27 = arith.subf %26, %25 : vector<1x2xf32>
    %28 = arith.index_cast %c0_i32 : i32 to index
    %c0_12 = arith.constant 0 : index
    %29 = vector.load %arg4[%28, %c0_12] : memref<8x2xf32, #tpu.memory_space<vmem>>, vector<1x2xf32>
    tpu.vector_store %arg4[%28, %c0_12], %27 {strides = array<i32>} : memref<8x2xf32, #tpu.memory_space<vmem>>, vector<1x2xf32>,
    %30 = arith.mulf %24, %6 : vector<1x2xf32>
    %cst_13 = arith.constant 0.000000e+00 : f32
    %31 = vector.broadcast %cst_13 : f32 to vector<1x2xf32>
    %32 = arith.subf %31, %30 : vector<1x2xf32>
    %33 = arith.index_cast %c0_i32 : i32 to index
    %c0_14 = arith.constant 0 : index
    %34 = vector.load %arg5[%33, %c0_14] : memref<8x2xf32, #tpu.memory_space<vmem>>, vector<1x2xf32>
    tpu.vector_store %arg5[%33, %c0_14], %32 {strides = array<i32>} : memref<8x2xf32, #tpu.memory_space<vmem>>, vector<1x2xf32>,
    %c1_i32 = arith.constant 1 : i32
    %35 = arith.index_cast %c1_i32 : i32 to index
    %c0_15 = arith.constant 0 : index
    %36 = vector.load %arg2[%35, %c0_15] : memref<8x2xf32, #tpu.memory_space<vmem>>, vector<1x2xf32>
    %cst_16 = arith.constant 2.000000e+00 : f32
    %37 = vector.broadcast %cst_16 : f32 to vector<1x2xf32>
    %38 = arith.mulf %37, %36 : vector<1x2xf32>
    %cst_17 = arith.constant 1.000000e+00 : f32
    %39 = vector.broadcast %cst_17 : f32 to vector<1x2xf32>
    %40 = arith.subf %39, %38 : vector<1x2xf32>
    %41 = arith.index_cast %c1_i32 : i32 to index
    %42 = memref.load %arg1[%41] : memref<8xi32, #tpu.memory_space<smem>>
    %43 = arith.index_cast %42 : i32 to index
    %c0_18 = arith.constant 0 : index
    %44 = vector.load %arg2[%43, %c0_18] : memref<8x2xf32, #tpu.memory_space<vmem>>, vector<1x2xf32>
    %cst_19 = arith.constant 2.000000e+00 : f32
    %45 = vector.broadcast %cst_19 : f32 to vector<1x2xf32>
    %46 = arith.mulf %45, %44 : vector<1x2xf32>
    %cst_20 = arith.constant 1.000000e+00 : f32
    %47 = vector.broadcast %cst_20 : f32 to vector<1x2xf32>
    %48 = arith.subf %47, %46 : vector<1x2xf32>
    %49 = arith.mulf %40, %22 : vector<1x2xf32>
    %50 = arith.mulf %49, %6 : vector<1x2xf32>
    %51 = arith.mulf %48, %24 : vector<1x2xf32>
    %52 = arith.mulf %51, %6 : vector<1x2xf32>
    %53 = arith.mulf %50, %6 : vector<1x2xf32>
    %cst_21 = arith.constant 0.000000e+00 : f32
    %54 = vector.broadcast %cst_21 : f32 to vector<1x2xf32>
    %55 = arith.subf %54, %53 : vector<1x2xf32>
    %56 = arith.index_cast %c1_i32 : i32 to index
    %c0_22 = arith.constant 0 : index
    %57 = vector.load %arg4[%56, %c0_22] : memref<8x2xf32, #tpu.memory_space<vmem>>, vector<1x2xf32>
    tpu.vector_store %arg4[%56, %c0_22], %55 {strides = array<i32>} : memref<8x2xf32, #tpu.memory_space<vmem>>, vector<1x2xf32>,
    %58 = arith.mulf %52, %6 : vector<1x2xf32>
    %cst_23 = arith.constant 0.000000e+00 : f32
    %59 = vector.broadcast %cst_23 : f32 to vector<1x2xf32>
    %60 = arith.subf %59, %58 : vector<1x2xf32>
    %61 = arith.index_cast %c1_i32 : i32 to index
    %c0_24 = arith.constant 0 : index
    %62 = vector.load %arg5[%61, %c0_24] : memref<8x2xf32, #tpu.memory_space<vmem>>, vector<1x2xf32>
    tpu.vector_store %arg5[%61, %c0_24], %60 {strides = array<i32>} : memref<8x2xf32, #tpu.memory_space<vmem>>, vector<1x2xf32>,
    %c2_i32 = arith.constant 2 : i32
    %63 = arith.index_cast %c2_i32 : i32 to index
    %c0_25 = arith.constant 0 : index
    %64 = vector.load %arg2[%63, %c0_25] : memref<8x2xf32, #tpu.memory_space<vmem>>, vector<1x2xf32>
    %cst_26 = arith.constant 2.000000e+00 : f32
    %65 = vector.broadcast %cst_26 : f32 to vector<1x2xf32>
    %66 = arith.mulf %65, %64 : vector<1x2xf32>
    %cst_27 = arith.constant 1.000000e+00 : f32
    %67 = vector.broadcast %cst_27 : f32 to vector<1x2xf32>
    %68 = arith.subf %67, %66 : vector<1x2xf32>
    %69 = arith.index_cast %c2_i32 : i32 to index
    %70 = memref.load %arg1[%69] : memref<8xi32, #tpu.memory_space<smem>>
    %71 = arith.index_cast %70 : i32 to index
    %c0_28 = arith.constant 0 : index
    %72 = vector.load %arg2[%71, %c0_28] : memref<8x2xf32, #tpu.memory_space<vmem>>, vector<1x2xf32>
    %cst_29 = arith.constant 2.000000e+00 : f32
    %73 = vector.broadcast %cst_29 : f32 to vector<1x2xf32>
    %74 = arith.mulf %73, %72 : vector<1x2xf32>
    %cst_30 = arith.constant 1.000000e+00 : f32
    %75 = vector.broadcast %cst_30 : f32 to vector<1x2xf32>
    %76 = arith.subf %75, %74 : vector<1x2xf32>
    %77 = arith.mulf %68, %50 : vector<1x2xf32>
    %78 = arith.mulf %77, %22 : vector<1x2xf32>
    %79 = arith.mulf %76, %52 : vector<1x2xf32>
    %80 = arith.mulf %79, %24 : vector<1x2xf32>
    %81 = arith.mulf %78, %22 : vector<1x2xf32>
    %cst_31 = arith.constant 0.000000e+00 : f32
    %82 = vector.broadcast %cst_31 : f32 to vector<1x2xf32>
    %83 = arith.subf %82, %81 : vector<1x2xf32>
    %84 = arith.index_cast %c2_i32 : i32 to index
    %c0_32 = arith.constant 0 : index
    %85 = vector.load %arg4[%84, %c0_32] : memref<8x2xf32, #tpu.memory_space<vmem>>, vector<1x2xf32>
    tpu.vector_store %arg4[%84, %c0_32], %83 {strides = array<i32>} : memref<8x2xf32, #tpu.memory_space<vmem>>, vector<1x2xf32>,
    %86 = arith.mulf %80, %24 : vector<1x2xf32>
    %cst_33 = arith.constant 0.000000e+00 : f32
    %87 = vector.broadcast %cst_33 : f32 to vector<1x2xf32>
    %88 = arith.subf %87, %86 : vector<1x2xf32>
    %89 = arith.index_cast %c2_i32 : i32 to index
    %c0_34 = arith.constant 0 : index
    %90 = vector.load %arg5[%89, %c0_34] : memref<8x2xf32, #tpu.memory_space<vmem>>, vector<1x2xf32>
    tpu.vector_store %arg5[%89, %c0_34], %88 {strides = array<i32>} : memref<8x2xf32, #tpu.memory_space<vmem>>, vector<1x2xf32>,
    %c3_i32 = arith.constant 3 : i32
    %91 = arith.index_cast %c3_i32 : i32 to index
    %c0_35 = arith.constant 0 : index
    %92 = vector.load %arg2[%91, %c0_35] : memref<8x2xf32, #tpu.memory_space<vmem>>, vector<1x2xf32>
    %cst_36 = arith.constant 2.000000e+00 : f32
    %93 = vector.broadcast %cst_36 : f32 to vector<1x2xf32>
    %94 = arith.mulf %93, %92 : vector<1x2xf32>
    %cst_37 = arith.constant 1.000000e+00 : f32
    %95 = vector.broadcast %cst_37 : f32 to vector<1x2xf32>
    %96 = arith.subf %95, %94 : vector<1x2xf32>
    %97 = arith.index_cast %c3_i32 : i32 to index
    %98 = memref.load %arg1[%97] : memref<8xi32, #tpu.memory_space<smem>>
    %99 = arith.index_cast %98 : i32 to index
    %c0_38 = arith.constant 0 : index
    %100 = vector.load %arg2[%99, %c0_38] : memref<8x2xf32, #tpu.memory_space<vmem>>, vector<1x2xf32>
    %cst_39 = arith.constant 2.000000e+00 : f32
    %101 = vector.broadcast %cst_39 : f32 to vector<1x2xf32>
    %102 = arith.mulf %101, %100 : vector<1x2xf32>
    %cst_40 = arith.constant 1.000000e+00 : f32
    %103 = vector.broadcast %cst_40 : f32 to vector<1x2xf32>
    %104 = arith.subf %103, %102 : vector<1x2xf32>
    %105 = arith.mulf %96, %78 : vector<1x2xf32>
    %106 = arith.mulf %105, %50 : vector<1x2xf32>
    %107 = arith.mulf %104, %80 : vector<1x2xf32>
    %108 = arith.mulf %107, %52 : vector<1x2xf32>
    %109 = arith.mulf %106, %50 : vector<1x2xf32>
    %cst_41 = arith.constant 0.000000e+00 : f32
    %110 = vector.broadcast %cst_41 : f32 to vector<1x2xf32>
    %111 = arith.subf %110, %109 : vector<1x2xf32>
    %112 = arith.index_cast %c3_i32 : i32 to index
    %c0_42 = arith.constant 0 : index
    %113 = vector.load %arg4[%112, %c0_42] : memref<8x2xf32, #tpu.memory_space<vmem>>, vector<1x2xf32>
    tpu.vector_store %arg4[%112, %c0_42], %111 {strides = array<i32>} : memref<8x2xf32, #tpu.memory_space<vmem>>, vector<1x2xf32>,
    %114 = arith.mulf %108, %52 : vector<1x2xf32>
    %cst_43 = arith.constant 0.000000e+00 : f32
    %115 = vector.broadcast %cst_43 : f32 to vector<1x2xf32>
    %116 = arith.subf %115, %114 : vector<1x2xf32>
    %117 = arith.index_cast %c3_i32 : i32 to index
    %c0_44 = arith.constant 0 : index
    %118 = vector.load %arg5[%117, %c0_44] : memref<8x2xf32, #tpu.memory_space<vmem>>, vector<1x2xf32>
    tpu.vector_store %arg5[%117, %c0_44], %116 {strides = array<i32>} : memref<8x2xf32, #tpu.memory_space<vmem>>, vector<1x2xf32>,
    %c4_i32 = arith.constant 4 : i32
    %119 = arith.index_cast %c4_i32 : i32 to index
    %c0_45 = arith.constant 0 : index
    %120 = vector.load %arg2[%119, %c0_45] : memref<8x2xf32, #tpu.memory_space<vmem>>, vector<1x2xf32>
    %cst_46 = arith.constant 2.000000e+00 : f32
    %121 = vector.broadcast %cst_46 : f32 to vector<1x2xf32>
    %122 = arith.mulf %121, %120 : vector<1x2xf32>
    %cst_47 = arith.constant 1.000000e+00 : f32
    %123 = vector.broadcast %cst_47 : f32 to vector<1x2xf32>
    %124 = arith.subf %123, %122 : vector<1x2xf32>
    %125 = arith.index_cast %c4_i32 : i32 to index
    %126 = memref.load %arg1[%125] : memref<8xi32, #tpu.memory_space<smem>>
    %127 = arith.index_cast %126 : i32 to index
    %c0_48 = arith.constant 0 : index
    %128 = vector.load %arg2[%127, %c0_48] : memref<8x2xf32, #tpu.memory_space<vmem>>, vector<1x2xf32>
    %cst_49 = arith.constant 2.000000e+00 : f32
    %129 = vector.broadcast %cst_49 : f32 to vector<1x2xf32>
    %130 = arith.mulf %129, %128 : vector<1x2xf32>
    %cst_50 = arith.constant 1.000000e+00 : f32
    %131 = vector.broadcast %cst_50 : f32 to vector<1x2xf32>
    %132 = arith.subf %131, %130 : vector<1x2xf32>
    %133 = arith.mulf %124, %106 : vector<1x2xf32>
    %134 = arith.mulf %133, %78 : vector<1x2xf32>
    %135 = arith.mulf %132, %108 : vector<1x2xf32>
    %136 = arith.mulf %135, %80 : vector<1x2xf32>
    %137 = arith.mulf %134, %78 : vector<1x2xf32>
    %cst_51 = arith.constant 0.000000e+00 : f32
    %138 = vector.broadcast %cst_51 : f32 to vector<1x2xf32>
    %139 = arith.subf %138, %137 : vector<1x2xf32>
    %140 = arith.index_cast %c4_i32 : i32 to index
    %c0_52 = arith.constant 0 : index
    %141 = vector.load %arg4[%140, %c0_52] : memref<8x2xf32, #tpu.memory_space<vmem>>, vector<1x2xf32>
    tpu.vector_store %arg4[%140, %c0_52], %139 {strides = array<i32>} : memref<8x2xf32, #tpu.memory_space<vmem>>, vector<1x2xf32>,
    %142 = arith.mulf %136, %80 : vector<1x2xf32>
    %cst_53 = arith.constant 0.000000e+00 : f32
    %143 = vector.broadcast %cst_53 : f32 to vector<1x2xf32>
    %144 = arith.subf %143, %142 : vector<1x2xf32>
    %145 = arith.index_cast %c4_i32 : i32 to index
    %c0_54 = arith.constant 0 : index
    %146 = vector.load %arg5[%145, %c0_54] : memref<8x2xf32, #tpu.memory_space<vmem>>, vector<1x2xf32>
    tpu.vector_store %arg5[%145, %c0_54], %144 {strides = array<i32>} : memref<8x2xf32, #tpu.memory_space<vmem>>, vector<1x2xf32>,
    %c5_i32 = arith.constant 5 : i32
    %147 = arith.index_cast %c5_i32 : i32 to index
    %c0_55 = arith.constant 0 : index
    %148 = vector.load %arg2[%147, %c0_55] : memref<8x2xf32, #tpu.memory_space<vmem>>, vector<1x2xf32>
    %cst_56 = arith.constant 2.000000e+00 : f32
    %149 = vector.broadcast %cst_56 : f32 to vector<1x2xf32>
    %150 = arith.mulf %149, %148 : vector<1x2xf32>
    %cst_57 = arith.constant 1.000000e+00 : f32
    %151 = vector.broadcast %cst_57 : f32 to vector<1x2xf32>
    %152 = arith.subf %151, %150 : vector<1x2xf32>
    %153 = arith.index_cast %c5_i32 : i32 to index
    %154 = memref.load %arg1[%153] : memref<8xi32, #tpu.memory_space<smem>>
    %155 = arith.index_cast %154 : i32 to index
    %c0_58 = arith.constant 0 : index
    %156 = vector.load %arg2[%155, %c0_58] : memref<8x2xf32, #tpu.memory_space<vmem>>, vector<1x2xf32>
    %cst_59 = arith.constant 2.000000e+00 : f32
    %157 = vector.broadcast %cst_59 : f32 to vector<1x2xf32>
    %158 = arith.mulf %157, %156 : vector<1x2xf32>
    %cst_60 = arith.constant 1.000000e+00 : f32
    %159 = vector.broadcast %cst_60 : f32 to vector<1x2xf32>
    %160 = arith.subf %159, %158 : vector<1x2xf32>
    %161 = arith.mulf %152, %134 : vector<1x2xf32>
    %162 = arith.mulf %161, %106 : vector<1x2xf32>
    %163 = arith.mulf %160, %136 : vector<1x2xf32>
    %164 = arith.mulf %163, %108 : vector<1x2xf32>
    %165 = arith.mulf %162, %106 : vector<1x2xf32>
    %cst_61 = arith.constant 0.000000e+00 : f32
    %166 = vector.broadcast %cst_61 : f32 to vector<1x2xf32>
    %167 = arith.subf %166, %165 : vector<1x2xf32>
    %168 = arith.index_cast %c5_i32 : i32 to index
    %c0_62 = arith.constant 0 : index
    %169 = vector.load %arg4[%168, %c0_62] : memref<8x2xf32, #tpu.memory_space<vmem>>, vector<1x2xf32>
    tpu.vector_store %arg4[%168, %c0_62], %167 {strides = array<i32>} : memref<8x2xf32, #tpu.memory_space<vmem>>, vector<1x2xf32>,
    %170 = arith.mulf %164, %108 : vector<1x2xf32>
    %cst_63 = arith.constant 0.000000e+00 : f32
    %171 = vector.broadcast %cst_63 : f32 to vector<1x2xf32>
    %172 = arith.subf %171, %170 : vector<1x2xf32>
    %173 = arith.index_cast %c5_i32 : i32 to index
    %c0_64 = arith.constant 0 : index
    %174 = vector.load %arg5[%173, %c0_64] : memref<8x2xf32, #tpu.memory_space<vmem>>, vector<1x2xf32>
    tpu.vector_store %arg5[%173, %c0_64], %172 {strides = array<i32>} : memref<8x2xf32, #tpu.memory_space<vmem>>, vector<1x2xf32>,
    %c6_i32 = arith.constant 6 : i32
    %175 = arith.index_cast %c6_i32 : i32 to index
    %c0_65 = arith.constant 0 : index
    %176 = vector.load %arg2[%175, %c0_65] : memref<8x2xf32, #tpu.memory_space<vmem>>, vector<1x2xf32>
    %cst_66 = arith.constant 2.000000e+00 : f32
    %177 = vector.broadcast %cst_66 : f32 to vector<1x2xf32>
    %178 = arith.mulf %177, %176 : vector<1x2xf32>
    %cst_67 = arith.constant 1.000000e+00 : f32
    %179 = vector.broadcast %cst_67 : f32 to vector<1x2xf32>
    %180 = arith.subf %179, %178 : vector<1x2xf32>
    %181 = arith.index_cast %c6_i32 : i32 to index
    %182 = memref.load %arg1[%181] : memref<8xi32, #tpu.memory_space<smem>>
    %183 = arith.index_cast %182 : i32 to index
    %c0_68 = arith.constant 0 : index
    %184 = vector.load %arg2[%183, %c0_68] : memref<8x2xf32, #tpu.memory_space<vmem>>, vector<1x2xf32>
    %cst_69 = arith.constant 2.000000e+00 : f32
    %185 = vector.broadcast %cst_69 : f32 to vector<1x2xf32>
    %186 = arith.mulf %185, %184 : vector<1x2xf32>
    %cst_70 = arith.constant 1.000000e+00 : f32
    %187 = vector.broadcast %cst_70 : f32 to vector<1x2xf32>
    %188 = arith.subf %187, %186 : vector<1x2xf32>
    %189 = arith.mulf %180, %162 : vector<1x2xf32>
    %190 = arith.mulf %189, %134 : vector<1x2xf32>
    %191 = arith.mulf %188, %164 : vector<1x2xf32>
    %192 = arith.mulf %191, %136 : vector<1x2xf32>
    %193 = arith.mulf %190, %134 : vector<1x2xf32>
    %cst_71 = arith.constant 0.000000e+00 : f32
    %194 = vector.broadcast %cst_71 : f32 to vector<1x2xf32>
    %195 = arith.subf %194, %193 : vector<1x2xf32>
    %196 = arith.index_cast %c6_i32 : i32 to index
    %c0_72 = arith.constant 0 : index
    %197 = vector.load %arg4[%196, %c0_72] : memref<8x2xf32, #tpu.memory_space<vmem>>, vector<1x2xf32>
    tpu.vector_store %arg4[%196, %c0_72], %195 {strides = array<i32>} : memref<8x2xf32, #tpu.memory_space<vmem>>, vector<1x2xf32>,
    %198 = arith.mulf %192, %136 : vector<1x2xf32>
    %cst_73 = arith.constant 0.000000e+00 : f32
    %199 = vector.broadcast %cst_73 : f32 to vector<1x2xf32>
    %200 = arith.subf %199, %198 : vector<1x2xf32>
    %201 = arith.index_cast %c6_i32 : i32 to index
    %c0_74 = arith.constant 0 : index
    %202 = vector.load %arg5[%201, %c0_74] : memref<8x2xf32, #tpu.memory_space<vmem>>, vector<1x2xf32>
    tpu.vector_store %arg5[%201, %c0_74], %200 {strides = array<i32>} : memref<8x2xf32, #tpu.memory_space<vmem>>, vector<1x2xf32>,
    %c7_i32 = arith.constant 7 : i32
    %203 = arith.index_cast %c7_i32 : i32 to index
    %c0_75 = arith.constant 0 : index
    %204 = vector.load %arg2[%203, %c0_75] : memref<8x2xf32, #tpu.memory_space<vmem>>, vector<1x2xf32>
    %cst_76 = arith.constant 2.000000e+00 : f32
    %205 = vector.broadcast %cst_76 : f32 to vector<1x2xf32>
    %206 = arith.mulf %205, %204 : vector<1x2xf32>
    %cst_77 = arith.constant 1.000000e+00 : f32
    %207 = vector.broadcast %cst_77 : f32 to vector<1x2xf32>
    %208 = arith.subf %207, %206 : vector<1x2xf32>
    %209 = arith.index_cast %c7_i32 : i32 to index
    %210 = memref.load %arg1[%209] : memref<8xi32, #tpu.memory_space<smem>>
    %211 = arith.index_cast %210 : i32 to index
    %c0_78 = arith.constant 0 : index
    %212 = vector.load %arg2[%211, %c0_78] : memref<8x2xf32, #tpu.memory_space<vmem>>, vector<1x2xf32>
    %cst_79 = arith.constant 2.000000e+00 : f32
    %213 = vector.broadcast %cst_79 : f32 to vector<1x2xf32>
    %214 = arith.mulf %213, %212 : vector<1x2xf32>
    %cst_80 = arith.constant 1.000000e+00 : f32
    %215 = vector.broadcast %cst_80 : f32 to vector<1x2xf32>
    %216 = arith.subf %215, %214 : vector<1x2xf32>
    %217 = arith.mulf %208, %190 : vector<1x2xf32>
    %218 = arith.mulf %217, %162 : vector<1x2xf32>
    %219 = arith.mulf %216, %192 : vector<1x2xf32>
    %220 = arith.mulf %219, %164 : vector<1x2xf32>
    %221 = arith.mulf %218, %162 : vector<1x2xf32>
    %cst_81 = arith.constant 0.000000e+00 : f32
    %222 = vector.broadcast %cst_81 : f32 to vector<1x2xf32>
    %223 = arith.subf %222, %221 : vector<1x2xf32>
    %224 = arith.index_cast %c7_i32 : i32 to index
    %c0_82 = arith.constant 0 : index
    %225 = vector.load %arg4[%224, %c0_82] : memref<8x2xf32, #tpu.memory_space<vmem>>, vector<1x2xf32>
    tpu.vector_store %arg4[%224, %c0_82], %223 {strides = array<i32>} : memref<8x2xf32, #tpu.memory_space<vmem>>, vector<1x2xf32>,
    %226 = arith.mulf %220, %164 : vector<1x2xf32>
    %cst_83 = arith.constant 0.000000e+00 : f32
    %227 = vector.broadcast %cst_83 : f32 to vector<1x2xf32>
    %228 = arith.subf %227, %226 : vector<1x2xf32>
    %229 = arith.index_cast %c7_i32 : i32 to index
    %c0_84 = arith.constant 0 : index
    %230 = vector.load %arg5[%229, %c0_84] : memref<8x2xf32, #tpu.memory_space<vmem>>, vector<1x2xf32>
    tpu.vector_store %arg5[%229, %c0_84], %228 {strides = array<i32>} : memref<8x2xf32, #tpu.memory_space<vmem>>, vector<1x2xf32>,
    %c8_i32 = arith.constant 8 : i32
    return
  }
  func.func @transform_0(%arg0: i32, %arg1: memref<8xi32, #tpu.memory_space<smem>>) -> (i32, i32) {
    %c0_i32 = arith.constant 0 : i32
    %c0_i32_0 = arith.constant 0 : i32
    return %c0_i32, %arg0 : i32, i32
  }
  func.func @transform_1(%arg0: i32, %arg1: memref<8xi32, #tpu.memory_space<smem>>) -> (i32, i32) {
    %c0_i32 = arith.constant 0 : i32
    %c0_i32_0 = arith.constant 0 : i32
    return %c0_i32, %arg0 : i32, i32
  }
  func.func @transform_2(%arg0: i32, %arg1: memref<8xi32, #tpu.memory_space<smem>>) -> (i32, i32) {
    %c0_i32 = arith.constant 0 : i32
    %c0_i32_0 = arith.constant 0 : i32
    return %c0_i32, %arg0 : i32, i32
  }
  func.func @transform_3(%arg0: i32, %arg1: memref<8xi32, #tpu.memory_space<smem>>) -> (i32, i32) {
    %c0_i32 = arith.constant 0 : i32
    %c0_i32_0 = arith.constant 0 : i32
    return %c0_i32, %arg0 : i32, i32
  }
}

</mosaic_0001>

<bundles_post_ra>
// kernel: turbo_code_forward.1
= control target key start
LH: loop header
LB: loop body
LE: loop exit
PB: predicated region body
PF: predicated region fallthrough
CT: control target
= control target key end

     0   :  { %s366_s0 = inlined_call_operand.vmem [shape: s32[8], index: 0, kind: input, shape index: {}]   ;;  %s367_s1 = inlined_call_operand.vmem [shape: f32[8,2], index: 1, kind: input, shape index: {}]   ;;  %s368_s2 = inlined_call_operand.vmem [shape: f32[8,2], index: 2, kind: output, shape index: {0}]   ;;  %s369_s3 = inlined_call_operand.vmem [shape: f32[8,2], index: 3, kind: output, shape index: {1}]   ;;  %s370_s4 = inlined_call_operand.vmem [shape: f32[8,2], index: 4, kind: output, shape index: {2}]  }
   0x1   :  { %s10_s17 = sshll.u32 %s366_s0, 4  ;;  %s11_s17 = int_to_ptr.vmem [resolvable:$true] %s10_s17 }
   0x2   :  { %s187_s18 = scalar_lea.vmem %s11_s17, 16  ;;  %p192_p1 = scmp.lt.s32.totalorder %s11_s17, %s11_s17 }
   0x3   :  { %p188_p0 = scmp.ne.s32.totalorder %s11_s17, %s187_s18  ;;  %p193_p2 = scmp.lt.s32.totalorder %s187_s18, %s187_s18 }
   0x5   :  { %p194_p3 = por %p193_p2, %p192_p1 }
   0x7   :  { %p195_p4 = pnand %p194_p3, %p188_p0 }
   0x9   :  { %198 = shalt.err (!%p195_p4)  }
   0xa   :  { %s201_s19 = smov [#allocation3]  }
   0xb   :  { %13 = dma.vmem_to_smem %s11_s17, 16, %s201_s19, [#allocation2] }
   0xc   :  { %199 = dma.done.wait [#allocation2], 16 }
   0xd   :  { %200 = vsyncadd [#allocation2], 4294967280 }
   0xe   :  { %15 = sfence }
   0xf   :  { %v18_v0 = vld [vmem:[%s367_s1] sm:$0xff]  ;;  %s26_s0 = sld [smem:[#allocation3]]  ;;  %vm21_vm0 = vcmask 15360   ;;  %vm32_vm1 = vcmask 8192  }
  0x10   :  { %v23_v1 = vld [vmem:[%s367_s1] sm:$0x1]  ;;  %v19_v2 = vmul.f32 2.0, %v18_v0  ;;  %v36_v4 = vld [vmem:[%s367_s1 + $0x1] sm:$0x1]  ;;  %s179_s26 = sld [smem:[#allocation3 + $0x1]] }
  0x11   :  { %v24_v3 = vmul.f32 2.0, %v23_v1  ;;  %v37_v5 = vmul.f32 2.0, %v36_v4  ;;  %v50_v6 = vld [vmem:[%s367_s1 + $0x2] sm:$0x1]  ;;  %s242_s29 = sld [smem:[#allocation3 + $0x2]] }
  0x12   :  { %v178_v7 = vadd.f32 -1.0, %v19_v2  ;;  %v51_v9 = vmul.f32 2.0, %v50_v6  ;;  %v68_v11 = vld [vmem:[%s367_s1 + $0x3] sm:$0x1]  ;;  %s247_s6 = sld [smem:[#allocation3 + $0x3]] }
  0x13   :  { %v25_v8 = vsub.f32 1.0, %v24_v3  ;;  %v38_v10 = vsub.f32 1.0, %v37_v5  ;;  %v69_v14 = vmul.f32 2.0, %v68_v11  ;;  %v86_v15 = vld [vmem:[%s367_s1 + $0x4] sm:$0x1]  ;;  %s255_s11 = sld [smem:[#allocation3 + $0x4]] }
  0x14   :  { %22 = vst.msk [vmem:[%s368_s2] sm:$0xff] %vm21_vm0, %v178_v7  ;;  %v52_v13 = vsub.f32 1.0, %v51_v9  ;;  %v87_v17 = vmul.f32 2.0, %v86_v15  ;;  %s264_s16 = sld [smem:[#allocation3 + $0x5]]  ;;  %v104_v22 = vld [vmem:[%s367_s1 + $0x5] sm:$0x1] }
  0x15   :  { %v31_v12 = vsub.f32 0.0, %v25_v8  ;;  %v44_v16 = vmul.f32 %v38_v10, %v25_v8  ;;  %s27_s2 = scalar_lea.vmem %s367_s1, %s26_s0  ;;  %v70_v21 = vsub.f32 1.0, %v69_v14  ;;  %s276_s24 = sld [smem:[#allocation3 + $0x6]]  ;;  %v105_v32 = vmul.f32 2.0, %v104_v22  ;;  %v122_v37 = vld [vmem:[%s367_s1 + $0x6] sm:$0x1] }
  0x16   :  { %v28_v18 = vld [vmem:[%s27_s2] sm:$0x1]  ;;  %s40_s19 = scalar_lea.vmem %s367_s1, %s179_s26  ;;  %v88_v31 = vsub.f32 1.0, %v87_v17  ;;  %s297_s13 = sld [smem:[#allocation3 + $0x7]]  ;;  %v123_v47 = vmul.f32 2.0, %v122_v37 }
  0x17   :  { %33 = vst.msk [vmem:[%s369_s3] sm:$0x1] %vm32_vm1, %v31_v12  ;;  %v46_v19 = vsub.f32 0.0, %v44_v16  ;;  %v58_v20 = vmul.f32 %v52_v13, %v44_v16  ;;  %v29_v23 = vmul.f32 2.0, %v28_v18  ;;  %v41_v24 = vld [vmem:[%s40_s19] sm:$0x1]  ;;  %s54_s0 = scalar_lea.vmem %s367_s1, %s242_s29 }
  0x18   :  { %v42_v25 = vmul.f32 2.0, %v41_v24  ;;  %v55_v27 = vld [vmem:[%s54_s0] sm:$0x1]  ;;  %s72_s30 = scalar_lea.vmem %s367_s1, %s247_s6  ;;  %v106_v46 = vsub.f32 1.0, %v105_v32  ;;  %v140_v53 = vld [vmem:[%s367_s1 + $0x7] sm:$0x1] }
  0x19   :  { %47 = vst.msk [vmem:[%s369_s3 + $0x1] sm:$0x1] %vm32_vm1, %v46_v19  ;;  %v59_v26 = vmul.f32 %v58_v20, %v25_v8  ;;  %v30_v28 = vsub.f32 1.0, %v29_v23  ;;  %v56_v29 = vmul.f32 2.0, %v55_v27  ;;  %v73_v30 = vld [vmem:[%s72_s30] sm:$0x1]  ;;  %s90_s7 = scalar_lea.vmem %s367_s1, %s255_s11 }
  0x1a   :  { %v43_v33 = vsub.f32 1.0, %v42_v25  ;;  %v74_v36 = vmul.f32 2.0, %v73_v30  ;;  %v91_v40 = vld [vmem:[%s90_s7] sm:$0x1]  ;;  %s108_s12 = scalar_lea.vmem %s367_s1, %s264_s16  ;;  %v124_v59 = vsub.f32 1.0, %v123_v47  ;;  %v141_v60 = vmul.f32 2.0, %v140_v53 }
  0x1b   :  { %v62_v34 = vmul.f32 %v59_v26, %v25_v8  ;;  %v76_v35 = vmul.f32 %v70_v21, %v59_v26  ;;  %v34_v38 = vsub.f32 0.0, %v30_v28  ;;  %v57_v39 = vsub.f32 1.0, %v56_v29  ;;  %v109_v52 = vld [vmem:[%s108_s12] sm:$0x1]  ;;  %s126_s20 = scalar_lea.vmem %s367_s1, %s276_s24 }
  0x1c   :  { %v45_v41 = vmul.f32 %v43_v33, %v30_v28  ;;  %v75_v44 = vsub.f32 1.0, %v74_v36  ;;  %v92_v45 = vmul.f32 2.0, %v91_v40  ;;  %v110_v58 = vmul.f32 2.0, %v109_v52  ;;  %v127_v1 = vld [vmem:[%s126_s20] sm:$0x1]  ;;  %s144_s27 = scalar_lea.vmem %s367_s1, %s297_s13 }
  0x1d   :  { %v63_v42 = vsub.f32 0.0, %v62_v34  ;;  %v77_v43 = vmul.f32 %v76_v35, %v44_v16  ;;  %35 = vst.msk [vmem:[%s370_s4] sm:$0x1] %vm32_vm1, %v34_v38  ;;  %v128_v7 = vmul.f32 2.0, %v127_v1  ;;  %v142_v8 = vsub.f32 1.0, %v141_v60 }
  0x1e   :  { %v48_v48 = vsub.f32 0.0, %v45_v41  ;;  %v60_v49 = vmul.f32 %v57_v39, %v45_v41  ;;  %v93_v57 = vsub.f32 1.0, %v92_v45  ;;  %v111_v6 = vsub.f32 1.0, %v110_v58  ;;  %v145_v13 = vld [vmem:[%s144_s27] sm:$0x1] }
  0x1f   :  { %64 = vst.msk [vmem:[%s369_s3 + $0x2] sm:$0x1] %vm32_vm1, %v63_v42  ;;  %v80_v50 = vmul.f32 %v77_v43, %v44_v16  ;;  %v94_v51 = vmul.f32 %v88_v31, %v77_v43  ;;  %v129_v18 = vsub.f32 1.0, %v128_v7  ;;  %v146_v19 = vmul.f32 2.0, %v145_v13 }
  0x20   :  { %49 = vst.msk [vmem:[%s370_s4 + $0x1] sm:$0x1] %vm32_vm1, %v48_v48  ;;  %v61_v54 = vmul.f32 %v60_v49, %v30_v28 }
  0x21   :  { %v81_v55 = vsub.f32 0.0, %v80_v50  ;;  %v95_v56 = vmul.f32 %v94_v51, %v59_v26  ;;  %v147_v31 = vsub.f32 1.0, %v146_v19 }
  0x22   :  { %v65_v61 = vmul.f32 %v61_v54, %v30_v28  ;;  %v78_v62 = vmul.f32 %v75_v44, %v61_v54 }
  0x23   :  { %82 = vst.msk [vmem:[%s369_s3 + $0x3] sm:$0x1] %vm32_vm1, %v81_v55  ;;  %v98_v63 = vmul.f32 %v95_v56, %v59_v26  ;;  %v112_v0 = vmul.f32 %v106_v46, %v95_v56 }
  0x24   :  { %v66_v2 = vsub.f32 0.0, %v65_v61  ;;  %v79_v3 = vmul.f32 %v78_v62, %v45_v41 }
  0x25   :  { %v99_v4 = vsub.f32 0.0, %v98_v63  ;;  %v113_v5 = vmul.f32 %v112_v0, %v77_v43 }
  0x26   :  { %67 = vst.msk [vmem:[%s370_s4 + $0x2] sm:$0x1] %vm32_vm1, %v66_v2  ;;  %v83_v9 = vmul.f32 %v79_v3, %v45_v41  ;;  %v96_v10 = vmul.f32 %v93_v57, %v79_v3 }
  0x27   :  { %100 = vst.msk [vmem:[%s369_s3 + $0x4] sm:$0x1] %vm32_vm1, %v99_v4  ;;  %v116_v11 = vmul.f32 %v113_v5, %v77_v43  ;;  %v130_v12 = vmul.f32 %v124_v59, %v113_v5 }
  0x28   :  { %v84_v14 = vsub.f32 0.0, %v83_v9  ;;  %v97_v15 = vmul.f32 %v96_v10, %v61_v54 }
  0x29   :  { %v117_v16 = vsub.f32 0.0, %v116_v11  ;;  %v131_v17 = vmul.f32 %v130_v12, %v95_v56 }
  0x2a   :  { %85 = vst.msk [vmem:[%s370_s4 + $0x3] sm:$0x1] %vm32_vm1, %v84_v14  ;;  %v101_v20 = vmul.f32 %v97_v15, %v61_v54  ;;  %v114_v21 = vmul.f32 %v111_v6, %v97_v15 }
  0x2b   :  { %118 = vst.msk [vmem:[%s369_s3 + $0x5] sm:$0x1] %vm32_vm1, %v117_v16  ;;  %v134_v22 = vmul.f32 %v131_v17, %v95_v56  ;;  %v148_v23 = vmul.f32 %v142_v8, %v131_v17 }
  0x2c   :  { %v102_v24 = vsub.f32 0.0, %v101_v20  ;;  %v115_v25 = vmul.f32 %v114_v21, %v79_v3 }
  0x2d   :  { %v135_v26 = vsub.f32 0.0, %v134_v22  ;;  %v149_v27 = vmul.f32 %v148_v23, %v113_v5 }
  0x2e   :  { %103 = vst.msk [vmem:[%s370_s4 + $0x4] sm:$0x1] %vm32_vm1, %v102_v24  ;;  %v119_v28 = vmul.f32 %v115_v25, %v79_v3  ;;  %v132_v29 = vmul.f32 %v129_v18, %v115_v25 }
  0x2f   :  { %136 = vst.msk [vmem:[%s369_s3 + $0x6] sm:$0x1] %vm32_vm1, %v135_v26  ;;  %v152_v30 = vmul.f32 %v149_v27, %v113_v5 }
  0x30   :  { %v120_v32 = vsub.f32 0.0, %v119_v28  ;;  %v133_v33 = vmul.f32 %v132_v29, %v97_v15 }
  0x31   :  { %v153_v34 = vsub.f32 0.0, %v152_v30 }
  0x32   :  { %121 = vst.msk [vmem:[%s370_s4 + $0x5] sm:$0x1] %vm32_vm1, %v120_v32  ;;  %v137_v35 = vmul.f32 %v133_v33, %v97_v15  ;;  %v150_v36 = vmul.f32 %v147_v31, %v133_v33 }
  0x33   :  { %154 = vst.msk [vmem:[%s369_s3 + $0x7] sm:$0x1] %vm32_vm1, %v153_v34 }
  0x34   :  { %v138_v37 = vsub.f32 0.0, %v137_v35  ;;  %v151_v38 = vmul.f32 %v150_v36, %v115_v25 }
  0x36   :  { %139 = vst.msk [vmem:[%s370_s4 + $0x6] sm:$0x1] %vm32_vm1, %v138_v37  ;;  %v155_v39 = vmul.f32 %v151_v38, %v115_v25 }
  0x38   :  { %v156_v40 = vsub.f32 0.0, %v155_v39 }
  0x3a   :  { %157 = vst.msk [vmem:[%s370_s4 + $0x7] sm:$0x1] %vm32_vm1, %v156_v40 }

</bundles_post_ra>
